<compile_context>
chip_gen: v7x
topology: tpu7x:2x2x1
jax: 0.10.0
libtpu: 0.0.40
codegen_flags: <defaults>
</compile_context>

<pallas_src>
import functools

import jax
import jax.numpy as jnp
from jax.experimental import pallas as pl
from jax.experimental.pallas import tpu as pltpu

# Module constants (from the PyTorch source)
LETTER = [c for c in 'SE?abcdefghijklmnopqrstuvwxyz']
N_CLASS = len(LETTER)   # 29
N_HIDDEN = 128

# Small-but-consistent example shapes
BATCH = 2
SEQ_ENC = 8
SEQ_DEC = 8

_LANE = 128
_SUBLANE = 8


def _round_up(x, m):
    return ((x + m - 1) // m) * m


def seq2seq_kernel(act_ref, w_ref, out_ref, dec_h_ref, *, t_enc, t_dec, b, h):
    """Encoder recurrence -> decoder recurrence -> deferred fc, all in VMEM.

    act_ref:   (b + (t_enc + t_dec) * b, 128) = [h0 | enc_proj | dec_proj]
               projections seq-major, flattened, RNN biases already folded in.
    w_ref:     (3*h + 8, 128) = [W_hh_enc^T | W_hh_dec^T | W_fc^T(padded) | b_fc x8]
    out_ref:   (t_dec * b, 128) lane-dense fc output (padding sliced off in wrapper)
    dec_h_ref: VMEM scratch (t_dec * b, h) for the deferred fc matmul
    """
    # Hidden state carried in vregs across the whole 16-step serial chain.
    hid = act_ref[0:b, :]

    # --- encoder recurrence (fully unrolled; static ref slices, loads at use site) ---
    for t in range(t_enc):
        x = act_ref[b + t * b:b + (t + 1) * b, :]
        hid = jnp.tanh(x + jnp.dot(hid, w_ref[0:h, :],
                                   preferred_element_type=jnp.float32))

    # --- decoder recurrence: per-step hidden stored lane-dense, fc deferred ---
    dec_off = b + t_enc * b
    for t in range(t_dec):
        x = act_ref[dec_off + t * b:dec_off + (t + 1) * b, :]
        hid = jnp.tanh(x + jnp.dot(hid, w_ref[h:2 * h, :],
                                   preferred_element_type=jnp.float32))
        dec_h_ref[t * b:(t + 1) * b, :] = hid

    # --- single batched fc projection + pre-broadcast bias, unmasked store ---
    fc = jnp.dot(dec_h_ref[...], w_ref[2 * h:3 * h, :],
                 preferred_element_type=jnp.float32)
    bias = jnp.tile(w_ref[3 * h:3 * h + _SUBLANE, :], (t_dec * b // _SUBLANE, 1))
    out_ref[...] = (fc + bias).astype(out_ref.dtype)


def prepare_params(params):
    """One-time packing of weights into kernel operands (hoisted out of per-call path)."""
    f32 = jnp.float32
    H = params['enc_w_hh'].shape[0]
    C = params['fc_w'].shape[0]
    assert H == _LANE, "kernel assumes hidden size == 128 lanes"
    N_pad = _round_up(max(C, _LANE), _LANE)                                  # 29 -> 128
    bfc = jnp.pad(params['fc_b'].astype(f32), (0, N_pad - C))
    w_slab = jnp.concatenate([
        params['enc_w_hh'].T.astype(f32),                                    # (H, H)
        params['dec_w_hh'].T.astype(f32),                                    # (H, H)
        jnp.pad(params['fc_w'].T.astype(f32), ((0, 0), (0, N_pad - C))),     # (H, N_pad)
        jnp.broadcast_to(bfc[None, :], (_SUBLANE, N_pad)),                   # (8, N_pad)
    ], axis=0)
    return {
        'w_slab': w_slab,                                               # (3H + 8, 128)
        'wih_e_t': params['enc_w_ih'].T.astype(f32),                    # (C, H)
        'wih_d_t': params['dec_w_ih'].T.astype(f32),                    # (C, H)
        'b_e': (params['enc_b_ih'] + params['enc_b_hh']).astype(f32),   # (H,)
        'b_d': (params['dec_b_ih'] + params['dec_b_hh']).astype(f32),   # (H,)
    }


@jax.jit
def seq2seq_forward(enc_input, enc_hidden, dec_input, prep):
    """enc_input: (B, T_enc, C), enc_hidden: (1, B, H), dec_input: (B, T_dec, C).
    Returns (T_dec, B, n_class) -- same as the PyTorch module."""
    f32 = jnp.float32
    B, T_enc, C = enc_input.shape
    T_dec = dec_input.shape[1]
    H = prep['wih_e_t'].shape[1]
    B_pad = _round_up(max(B, _SUBLANE), _SUBLANE)   # 2 -> 8 sublanes
    N_pad = prep['w_slab'].shape[1]                 # 128 lanes

    def proj(x, w_t, bias, T):
        # Seq-major input projection with both RNN biases folded in.
        # For the module's one-hot inputs this is just a row gather of W_ih^T.
        p = jnp.einsum('btc,ch->tbh', x.astype(f32), w_t,
                       precision=jax.lax.Precision.HIGHEST) + bias
        p = jnp.pad(p, ((0, 0), (0, B_pad - B), (0, 0)))
        return p.reshape(T * B_pad, H)

    enc_proj = proj(enc_input, prep['wih_e_t'], prep['b_e'], T_enc)
    dec_proj = proj(dec_input, prep['wih_d_t'], prep['b_d'], T_dec)
    h0 = jnp.pad(enc_hidden[0].astype(f32), ((0, B_pad - B), (0, 0)))   # (B_pad, H)
    act = jnp.concatenate([h0, enc_proj, dec_proj], axis=0)             # (136, 128)

    vmem = pl.BlockSpec(memory_space=pltpu.MemorySpace.VMEM)
    kernel = functools.partial(seq2seq_kernel, t_enc=T_enc, t_dec=T_dec, b=B_pad, h=H)
    out2 = pl.pallas_call(
        kernel,
        out_shape=jax.ShapeDtypeStruct((T_dec * B_pad, N_pad), f32),
        in_specs=[vmem, vmem],
        out_specs=vmem,
        scratch_shapes=[pltpu.VMEM((T_dec * B_pad, H), f32)],
    )(act, prep['w_slab'])

    # strip padding: (T_dec, B_pad, N_pad) -> (T_dec, B, n_class)
    return out2.reshape(T_dec, B_pad, N_pad)[:, :B, :C]


def init_params(key):
    """Deterministic parameter init matching PyTorch's RNN/Linear shapes."""
    ks = jax.random.split(key, 10)
    bound = 1.0 / jnp.sqrt(N_HIDDEN)
    u = lambda k, shape: jax.random.uniform(k, shape, jnp.float32, -bound, bound)
    return {
        'enc_w_ih': u(ks[0], (N_HIDDEN, N_CLASS)),
        'enc_w_hh': u(ks[1], (N_HIDDEN, N_HIDDEN)),
        'enc_b_ih': u(ks[2], (N_HIDDEN,)),
        'enc_b_hh': u(ks[3], (N_HIDDEN,)),
        'dec_w_ih': u(ks[4], (N_HIDDEN, N_CLASS)),
        'dec_w_hh': u(ks[5], (N_HIDDEN, N_HIDDEN)),
        'dec_b_ih': u(ks[6], (N_HIDDEN,)),
        'dec_b_hh': u(ks[7], (N_HIDDEN,)),
        'fc_w': u(ks[8], (N_CLASS, N_HIDDEN)),
        'fc_b': u(ks[9], (N_CLASS,)),
    }


def seq2seq_reference(enc_input, enc_hidden, dec_input, params):
    """Pure-JAX reference of the PyTorch forward (dropout is a no-op: num_layers=1)."""
    enc_x = jnp.transpose(enc_input, (1, 0, 2))
    dec_x = jnp.transpose(dec_input, (1, 0, 2))
    h = enc_hidden[0]

    def rnn_step(h, x_t, wih, whh, bih, bhh):
        return jnp.tanh(x_t @ wih.T + bih + h @ whh.T + bhh)

    for t in range(enc_x.shape[0]):
        h = rnn_step(h, enc_x[t], params['enc_w_ih'], params['enc_w_hh'],
                     params['enc_b_ih'], params['enc_b_hh'])
    outs = []
    for t in range(dec_x.shape[0]):
        h = rnn_step(h, dec_x[t], params['dec_w_ih'], params['dec_w_hh'],
                     params['dec_b_ih'], params['dec_b_hh'])
        outs.append(h)
    dec_out = jnp.stack(outs, axis=0)                     # (T_dec, B, H)
    return dec_out @ params['fc_w'].T + params['fc_b']    # (T_dec, B, n_class)


if __name__ == "__main__":
    key = jax.random.PRNGKey(0)
    k_par, k_enc, k_dec = jax.random.split(key, 3)

    params = init_params(k_par)
    prep = prepare_params(params)   # weight packing hoisted out of the per-call path

    # one-hot inputs (the model consumes float vectors of size n_class)
    enc_ids = jax.random.randint(k_enc, (BATCH, SEQ_ENC), 0, N_CLASS)
    dec_ids = jax.random.randint(k_dec, (BATCH, SEQ_DEC), 0, N_CLASS)
    enc_input = jax.nn.one_hot(enc_ids, N_CLASS, dtype=jnp.float32)   # (B, T_enc, C)
    dec_input = jax.nn.one_hot(dec_ids, N_CLASS, dtype=jnp.float32)   # (B, T_dec, C)
    enc_hidden = jnp.zeros((1, BATCH, N_HIDDEN), jnp.float32)

    out = seq2seq_forward(enc_input, enc_hidden, dec_input, prep)
    out = jax.block_until_ready(out)

    ref = seq2seq_reference(enc_input, enc_hidden, dec_input, params)
    assert out.shape == (SEQ_DEC, BATCH, N_CLASS), out.shape
    assert jnp.allclose(out, ref, atol=2e-5, rtol=1e-5), "mismatch vs reference"

    print("KERNEL_OK")
</pallas_src>

<mosaic_0001>
module attributes {stable_mosaic.version = 11 : i64} {
  func.func @seq2seq_kernel(%arg0: memref<136x128xf32, #tpu.memory_space<vmem>>, %arg1: memref<392x128xf32, #tpu.memory_space<vmem>>, %arg2: memref<64x128xf32, #tpu.memory_space<vmem>>, %arg3: memref<64x128xf32, #tpu.memory_space<vmem>>) attributes {dimension_semantics = [], scalar_prefetch = 0 : i64, scratch_operands = 1 : i64, tpu.core_type = #tpu.core_type<tc>} {
    %c0 = arith.constant 0 : index
    %c0_0 = arith.constant 0 : index
    %0 = vector.load %arg0[%c0, %c0_0] : memref<136x128xf32, #tpu.memory_space<vmem>>, vector<8x128xf32>
    %c8 = arith.constant 8 : index
    %c0_1 = arith.constant 0 : index
    %1 = vector.load %arg0[%c8, %c0_1] : memref<136x128xf32, #tpu.memory_space<vmem>>, vector<8x128xf32>
    %c0_2 = arith.constant 0 : index
    %c0_3 = arith.constant 0 : index
    %2 = vector.load %arg1[%c0_2, %c0_3] : memref<392x128xf32, #tpu.memory_space<vmem>>, vector<128x128xf32>
    %cst = arith.constant dense<0.000000e+00> : vector<8x128xf32>
    %3 = tpu.matmul %0, %2, %cst {dimension_numbers = #tpu.dot_dimension_numbers<[1], [0], [0], [1], [0, 0, 1, 1], [], []>} : vector<8x128xf32>, vector<128x128xf32>, vector<8x128xf32> -> vector<8x128xf32>
    %4 = arith.addf %1, %3 : vector<8x128xf32>
    %5 = math.tanh %4 : vector<8x128xf32>
    %c16 = arith.constant 16 : index
    %c0_4 = arith.constant 0 : index
    %6 = vector.load %arg0[%c16, %c0_4] : memref<136x128xf32, #tpu.memory_space<vmem>>, vector<8x128xf32>
    %c0_5 = arith.constant 0 : index
    %c0_6 = arith.constant 0 : index
    %7 = vector.load %arg1[%c0_5, %c0_6] : memref<392x128xf32, #tpu.memory_space<vmem>>, vector<128x128xf32>
    %cst_7 = arith.constant dense<0.000000e+00> : vector<8x128xf32>
    %8 = tpu.matmul %5, %7, %cst_7 {dimension_numbers = #tpu.dot_dimension_numbers<[1], [0], [0], [1], [0, 0, 1, 1], [], []>} : vector<8x128xf32>, vector<128x128xf32>, vector<8x128xf32> -> vector<8x128xf32>
    %9 = arith.addf %6, %8 : vector<8x128xf32>
    %10 = math.tanh %9 : vector<8x128xf32>
    %c24 = arith.constant 24 : index
    %c0_8 = arith.constant 0 : index
    %11 = vector.load %arg0[%c24, %c0_8] : memref<136x128xf32, #tpu.memory_space<vmem>>, vector<8x128xf32>
    %c0_9 = arith.constant 0 : index
    %c0_10 = arith.constant 0 : index
    %12 = vector.load %arg1[%c0_9, %c0_10] : memref<392x128xf32, #tpu.memory_space<vmem>>, vector<128x128xf32>
    %cst_11 = arith.constant dense<0.000000e+00> : vector<8x128xf32>
    %13 = tpu.matmul %10, %12, %cst_11 {dimension_numbers = #tpu.dot_dimension_numbers<[1], [0], [0], [1], [0, 0, 1, 1], [], []>} : vector<8x128xf32>, vector<128x128xf32>, vector<8x128xf32> -> vector<8x128xf32>
    %14 = arith.addf %11, %13 : vector<8x128xf32>
    %15 = math.tanh %14 : vector<8x128xf32>
    %c32 = arith.constant 32 : index
    %c0_12 = arith.constant 0 : index
    %16 = vector.load %arg0[%c32, %c0_12] : memref<136x128xf32, #tpu.memory_space<vmem>>, vector<8x128xf32>
    %c0_13 = arith.constant 0 : index
    %c0_14 = arith.constant 0 : index
    %17 = vector.load %arg1[%c0_13, %c0_14] : memref<392x128xf32, #tpu.memory_space<vmem>>, vector<128x128xf32>
    %cst_15 = arith.constant dense<0.000000e+00> : vector<8x128xf32>
    %18 = tpu.matmul %15, %17, %cst_15 {dimension_numbers = #tpu.dot_dimension_numbers<[1], [0], [0], [1], [0, 0, 1, 1], [], []>} : vector<8x128xf32>, vector<128x128xf32>, vector<8x128xf32> -> vector<8x128xf32>
    %19 = arith.addf %16, %18 : vector<8x128xf32>
    %20 = math.tanh %19 : vector<8x128xf32>
    %c40 = arith.constant 40 : index
    %c0_16 = arith.constant 0 : index
    %21 = vector.load %arg0[%c40, %c0_16] : memref<136x128xf32, #tpu.memory_space<vmem>>, vector<8x128xf32>
    %c0_17 = arith.constant 0 : index
    %c0_18 = arith.constant 0 : index
    %22 = vector.load %arg1[%c0_17, %c0_18] : memref<392x128xf32, #tpu.memory_space<vmem>>, vector<128x128xf32>
    %cst_19 = arith.constant dense<0.000000e+00> : vector<8x128xf32>
    %23 = tpu.matmul %20, %22, %cst_19 {dimension_numbers = #tpu.dot_dimension_numbers<[1], [0], [0], [1], [0, 0, 1, 1], [], []>} : vector<8x128xf32>, vector<128x128xf32>, vector<8x128xf32> -> vector<8x128xf32>
    %24 = arith.addf %21, %23 : vector<8x128xf32>
    %25 = math.tanh %24 : vector<8x128xf32>
    %c48 = arith.constant 48 : index
    %c0_20 = arith.constant 0 : index
    %26 = vector.load %arg0[%c48, %c0_20] : memref<136x128xf32, #tpu.memory_space<vmem>>, vector<8x128xf32>
    %c0_21 = arith.constant 0 : index
    %c0_22 = arith.constant 0 : index
    %27 = vector.load %arg1[%c0_21, %c0_22] : memref<392x128xf32, #tpu.memory_space<vmem>>, vector<128x128xf32>
    %cst_23 = arith.constant dense<0.000000e+00> : vector<8x128xf32>
    %28 = tpu.matmul %25, %27, %cst_23 {dimension_numbers = #tpu.dot_dimension_numbers<[1], [0], [0], [1], [0, 0, 1, 1], [], []>} : vector<8x128xf32>, vector<128x128xf32>, vector<8x128xf32> -> vector<8x128xf32>
    %29 = arith.addf %26, %28 : vector<8x128xf32>
    %30 = math.tanh %29 : vector<8x128xf32>
    %c56 = arith.constant 56 : index
    %c0_24 = arith.constant 0 : index
    %31 = vector.load %arg0[%c56, %c0_24] : memref<136x128xf32, #tpu.memory_space<vmem>>, vector<8x128xf32>
    %c0_25 = arith.constant 0 : index
    %c0_26 = arith.constant 0 : index
    %32 = vector.load %arg1[%c0_25, %c0_26] : memref<392x128xf32, #tpu.memory_space<vmem>>, vector<128x128xf32>
    %cst_27 = arith.constant dense<0.000000e+00> : vector<8x128xf32>
    %33 = tpu.matmul %30, %32, %cst_27 {dimension_numbers = #tpu.dot_dimension_numbers<[1], [0], [0], [1], [0, 0, 1, 1], [], []>} : vector<8x128xf32>, vector<128x128xf32>, vector<8x128xf32> -> vector<8x128xf32>
    %34 = arith.addf %31, %33 : vector<8x128xf32>
    %35 = math.tanh %34 : vector<8x128xf32>
    %c64 = arith.constant 64 : index
    %c0_28 = arith.constant 0 : index
    %36 = vector.load %arg0[%c64, %c0_28] : memref<136x128xf32, #tpu.memory_space<vmem>>, vector<8x128xf32>
    %c0_29 = arith.constant 0 : index
    %c0_30 = arith.constant 0 : index
    %37 = vector.load %arg1[%c0_29, %c0_30] : memref<392x128xf32, #tpu.memory_space<vmem>>, vector<128x128xf32>
    %cst_31 = arith.constant dense<0.000000e+00> : vector<8x128xf32>
    %38 = tpu.matmul %35, %37, %cst_31 {dimension_numbers = #tpu.dot_dimension_numbers<[1], [0], [0], [1], [0, 0, 1, 1], [], []>} : vector<8x128xf32>, vector<128x128xf32>, vector<8x128xf32> -> vector<8x128xf32>
    %39 = arith.addf %36, %38 : vector<8x128xf32>
    %40 = math.tanh %39 : vector<8x128xf32>
    %c72 = arith.constant 72 : index
    %c0_32 = arith.constant 0 : index
    %41 = vector.load %arg0[%c72, %c0_32] : memref<136x128xf32, #tpu.memory_space<vmem>>, vector<8x128xf32>
    %c128 = arith.constant 128 : index
    %c0_33 = arith.constant 0 : index
    %42 = vector.load %arg1[%c128, %c0_33] : memref<392x128xf32, #tpu.memory_space<vmem>>, vector<128x128xf32>
    %cst_34 = arith.constant dense<0.000000e+00> : vector<8x128xf32>
    %43 = tpu.matmul %40, %42, %cst_34 {dimension_numbers = #tpu.dot_dimension_numbers<[1], [0], [0], [1], [0, 0, 1, 1], [], []>} : vector<8x128xf32>, vector<128x128xf32>, vector<8x128xf32> -> vector<8x128xf32>
    %44 = arith.addf %41, %43 : vector<8x128xf32>
    %45 = math.tanh %44 : vector<8x128xf32>
    %c0_35 = arith.constant 0 : index
    %c0_36 = arith.constant 0 : index
    %46 = vector.load %arg3[%c0_35, %c0_36] : memref<64x128xf32, #tpu.memory_space<vmem>>, vector<8x128xf32>
    tpu.vector_store %arg3[%c0_35, %c0_36], %45 {strides = array<i32>} : memref<64x128xf32, #tpu.memory_space<vmem>>, vector<8x128xf32>,
    %c80 = arith.constant 80 : index
    %c0_37 = arith.constant 0 : index
    %47 = vector.load %arg0[%c80, %c0_37] : memref<136x128xf32, #tpu.memory_space<vmem>>, vector<8x128xf32>
    %c128_38 = arith.constant 128 : index
    %c0_39 = arith.constant 0 : index
    %48 = vector.load %arg1[%c128_38, %c0_39] : memref<392x128xf32, #tpu.memory_space<vmem>>, vector<128x128xf32>
    %cst_40 = arith.constant dense<0.000000e+00> : vector<8x128xf32>
    %49 = tpu.matmul %45, %48, %cst_40 {dimension_numbers = #tpu.dot_dimension_numbers<[1], [0], [0], [1], [0, 0, 1, 1], [], []>} : vector<8x128xf32>, vector<128x128xf32>, vector<8x128xf32> -> vector<8x128xf32>
    %50 = arith.addf %47, %49 : vector<8x128xf32>
    %51 = math.tanh %50 : vector<8x128xf32>
    %c8_41 = arith.constant 8 : index
    %c0_42 = arith.constant 0 : index
    %52 = vector.load %arg3[%c8_41, %c0_42] : memref<64x128xf32, #tpu.memory_space<vmem>>, vector<8x128xf32>
    tpu.vector_store %arg3[%c8_41, %c0_42], %51 {strides = array<i32>} : memref<64x128xf32, #tpu.memory_space<vmem>>, vector<8x128xf32>,
    %c88 = arith.constant 88 : index
    %c0_43 = arith.constant 0 : index
    %53 = vector.load %arg0[%c88, %c0_43] : memref<136x128xf32, #tpu.memory_space<vmem>>, vector<8x128xf32>
    %c128_44 = arith.constant 128 : index
    %c0_45 = arith.constant 0 : index
    %54 = vector.load %arg1[%c128_44, %c0_45] : memref<392x128xf32, #tpu.memory_space<vmem>>, vector<128x128xf32>
    %cst_46 = arith.constant dense<0.000000e+00> : vector<8x128xf32>
    %55 = tpu.matmul %51, %54, %cst_46 {dimension_numbers = #tpu.dot_dimension_numbers<[1], [0], [0], [1], [0, 0, 1, 1], [], []>} : vector<8x128xf32>, vector<128x128xf32>, vector<8x128xf32> -> vector<8x128xf32>
    %56 = arith.addf %53, %55 : vector<8x128xf32>
    %57 = math.tanh %56 : vector<8x128xf32>
    %c16_47 = arith.constant 16 : index
    %c0_48 = arith.constant 0 : index
    %58 = vector.load %arg3[%c16_47, %c0_48] : memref<64x128xf32, #tpu.memory_space<vmem>>, vector<8x128xf32>
    tpu.vector_store %arg3[%c16_47, %c0_48], %57 {strides = array<i32>} : memref<64x128xf32, #tpu.memory_space<vmem>>, vector<8x128xf32>,
    %c96 = arith.constant 96 : index
    %c0_49 = arith.constant 0 : index
    %59 = vector.load %arg0[%c96, %c0_49] : memref<136x128xf32, #tpu.memory_space<vmem>>, vector<8x128xf32>
    %c128_50 = arith.constant 128 : index
    %c0_51 = arith.constant 0 : index
    %60 = vector.load %arg1[%c128_50, %c0_51] : memref<392x128xf32, #tpu.memory_space<vmem>>, vector<128x128xf32>
    %cst_52 = arith.constant dense<0.000000e+00> : vector<8x128xf32>
    %61 = tpu.matmul %57, %60, %cst_52 {dimension_numbers = #tpu.dot_dimension_numbers<[1], [0], [0], [1], [0, 0, 1, 1], [], []>} : vector<8x128xf32>, vector<128x128xf32>, vector<8x128xf32> -> vector<8x128xf32>
    %62 = arith.addf %59, %61 : vector<8x128xf32>
    %63 = math.tanh %62 : vector<8x128xf32>
    %c24_53 = arith.constant 24 : index
    %c0_54 = arith.constant 0 : index
    %64 = vector.load %arg3[%c24_53, %c0_54] : memref<64x128xf32, #tpu.memory_space<vmem>>, vector<8x128xf32>
    tpu.vector_store %arg3[%c24_53, %c0_54], %63 {strides = array<i32>} : memref<64x128xf32, #tpu.memory_space<vmem>>, vector<8x128xf32>,
    %c104 = arith.constant 104 : index
    %c0_55 = arith.constant 0 : index
    %65 = vector.load %arg0[%c104, %c0_55] : memref<136x128xf32, #tpu.memory_space<vmem>>, vector<8x128xf32>
    %c128_56 = arith.constant 128 : index
    %c0_57 = arith.constant 0 : index
    %66 = vector.load %arg1[%c128_56, %c0_57] : memref<392x128xf32, #tpu.memory_space<vmem>>, vector<128x128xf32>
    %cst_58 = arith.constant dense<0.000000e+00> : vector<8x128xf32>
    %67 = tpu.matmul %63, %66, %cst_58 {dimension_numbers = #tpu.dot_dimension_numbers<[1], [0], [0], [1], [0, 0, 1, 1], [], []>} : vector<8x128xf32>, vector<128x128xf32>, vector<8x128xf32> -> vector<8x128xf32>
    %68 = arith.addf %65, %67 : vector<8x128xf32>
    %69 = math.tanh %68 : vector<8x128xf32>
    %c32_59 = arith.constant 32 : index
    %c0_60 = arith.constant 0 : index
    %70 = vector.load %arg3[%c32_59, %c0_60] : memref<64x128xf32, #tpu.memory_space<vmem>>, vector<8x128xf32>
    tpu.vector_store %arg3[%c32_59, %c0_60], %69 {strides = array<i32>} : memref<64x128xf32, #tpu.memory_space<vmem>>, vector<8x128xf32>,
    %c112 = arith.constant 112 : index
    %c0_61 = arith.constant 0 : index
    %71 = vector.load %arg0[%c112, %c0_61] : memref<136x128xf32, #tpu.memory_space<vmem>>, vector<8x128xf32>
    %c128_62 = arith.constant 128 : index
    %c0_63 = arith.constant 0 : index
    %72 = vector.load %arg1[%c128_62, %c0_63] : memref<392x128xf32, #tpu.memory_space<vmem>>, vector<128x128xf32>
    %cst_64 = arith.constant dense<0.000000e+00> : vector<8x128xf32>
    %73 = tpu.matmul %69, %72, %cst_64 {dimension_numbers = #tpu.dot_dimension_numbers<[1], [0], [0], [1], [0, 0, 1, 1], [], []>} : vector<8x128xf32>, vector<128x128xf32>, vector<8x128xf32> -> vector<8x128xf32>
    %74 = arith.addf %71, %73 : vector<8x128xf32>
    %75 = math.tanh %74 : vector<8x128xf32>
    %c40_65 = arith.constant 40 : index
    %c0_66 = arith.constant 0 : index
    %76 = vector.load %arg3[%c40_65, %c0_66] : memref<64x128xf32, #tpu.memory_space<vmem>>, vector<8x128xf32>
    tpu.vector_store %arg3[%c40_65, %c0_66], %75 {strides = array<i32>} : memref<64x128xf32, #tpu.memory_space<vmem>>, vector<8x128xf32>,
    %c120 = arith.constant 120 : index
    %c0_67 = arith.constant 0 : index
    %77 = vector.load %arg0[%c120, %c0_67] : memref<136x128xf32, #tpu.memory_space<vmem>>, vector<8x128xf32>
    %c128_68 = arith.constant 128 : index
    %c0_69 = arith.constant 0 : index
    %78 = vector.load %arg1[%c128_68, %c0_69] : memref<392x128xf32, #tpu.memory_space<vmem>>, vector<128x128xf32>
    %cst_70 = arith.constant dense<0.000000e+00> : vector<8x128xf32>
    %79 = tpu.matmul %75, %78, %cst_70 {dimension_numbers = #tpu.dot_dimension_numbers<[1], [0], [0], [1], [0, 0, 1, 1], [], []>} : vector<8x128xf32>, vector<128x128xf32>, vector<8x128xf32> -> vector<8x128xf32>
    %80 = arith.addf %77, %79 : vector<8x128xf32>
    %81 = math.tanh %80 : vector<8x128xf32>
    %c48_71 = arith.constant 48 : index
    %c0_72 = arith.constant 0 : index
    %82 = vector.load %arg3[%c48_71, %c0_72] : memref<64x128xf32, #tpu.memory_space<vmem>>, vector<8x128xf32>
    tpu.vector_store %arg3[%c48_71, %c0_72], %81 {strides = array<i32>} : memref<64x128xf32, #tpu.memory_space<vmem>>, vector<8x128xf32>,
    %c128_73 = arith.constant 128 : index
    %c0_74 = arith.constant 0 : index
    %83 = vector.load %arg0[%c128_73, %c0_74] : memref<136x128xf32, #tpu.memory_space<vmem>>, vector<8x128xf32>
    %c128_75 = arith.constant 128 : index
    %c0_76 = arith.constant 0 : index
    %84 = vector.load %arg1[%c128_75, %c0_76] : memref<392x128xf32, #tpu.memory_space<vmem>>, vector<128x128xf32>
    %cst_77 = arith.constant dense<0.000000e+00> : vector<8x128xf32>
    %85 = tpu.matmul %81, %84, %cst_77 {dimension_numbers = #tpu.dot_dimension_numbers<[1], [0], [0], [1], [0, 0, 1, 1], [], []>} : vector<8x128xf32>, vector<128x128xf32>, vector<8x128xf32> -> vector<8x128xf32>
    %86 = arith.addf %83, %85 : vector<8x128xf32>
    %87 = math.tanh %86 : vector<8x128xf32>
    %c56_78 = arith.constant 56 : index
    %c0_79 = arith.constant 0 : index
    %88 = vector.load %arg3[%c56_78, %c0_79] : memref<64x128xf32, #tpu.memory_space<vmem>>, vector<8x128xf32>
    tpu.vector_store %arg3[%c56_78, %c0_79], %87 {strides = array<i32>} : memref<64x128xf32, #tpu.memory_space<vmem>>, vector<8x128xf32>,
    %c0_80 = arith.constant 0 : index
    %c0_81 = arith.constant 0 : index
    %89 = vector.load %arg3[%c0_80, %c0_81] : memref<64x128xf32, #tpu.memory_space<vmem>>, vector<64x128xf32>
    %c256 = arith.constant 256 : index
    %c0_82 = arith.constant 0 : index
    %90 = vector.load %arg1[%c256, %c0_82] : memref<392x128xf32, #tpu.memory_space<vmem>>, vector<128x128xf32>
    %cst_83 = arith.constant dense<0.000000e+00> : vector<64x128xf32>
    %91 = tpu.matmul %89, %90, %cst_83 {dimension_numbers = #tpu.dot_dimension_numbers<[1], [0], [0], [1], [0, 0, 1, 1], [], []>} : vector<64x128xf32>, vector<128x128xf32>, vector<64x128xf32> -> vector<64x128xf32>
    %c384 = arith.constant 384 : index
    %c0_84 = arith.constant 0 : index
    %92 = vector.load %arg1[%c384, %c0_84] : memref<392x128xf32, #tpu.memory_space<vmem>>, vector<8x128xf32>
    %93 = tpu.concatenate %92, %92, %92, %92, %92, %92, %92, %92 in 0 : vector<8x128xf32>, vector<8x128xf32>, vector<8x128xf32>, vector<8x128xf32>, vector<8x128xf32>, vector<8x128xf32>, vector<8x128xf32>, vector<8x128xf32> -> vector<64x128xf32>
    %94 = arith.addf %91, %93 : vector<64x128xf32>
    %c0_85 = arith.constant 0 : index
    %c0_86 = arith.constant 0 : index
    %95 = vector.load %arg2[%c0_85, %c0_86] : memref<64x128xf32, #tpu.memory_space<vmem>>, vector<64x128xf32>
    tpu.vector_store %arg2[%c0_85, %c0_86], %94 {strides = array<i32>} : memref<64x128xf32, #tpu.memory_space<vmem>>, vector<64x128xf32>,
    return
  }
}

</mosaic_0001>

<bundles_post_ra>
// kernel: seq2seq_forward.1
= control target key start
LH: loop header
LB: loop body
LE: loop exit
PB: predicated region body
PF: predicated region fallthrough
CT: control target
= control target key end

     0   :  { %v2825_v0 = vmov 0.0|0.0   ;;  %vm2826_vm0 = vmmov 0   ;;  %v2827_v4 = vmov 0.0   ;;  %s3405_s1 = inlined_call_operand.vmem [shape: f32[392,128], index: 1, kind: input, shape index: {}]   ;;  %s3406_s0 = inlined_call_operand.vmem [shape: f32[136,128], index: 0, kind: input, shape index: {}]   ;;  %s3407_s2 = inlined_call_operand.vmem [shape: f32[64,128], index: 2, kind: output, shape index: {}]  }
   0x1   :  { %2374 = vmatprep.subr.bf16.mxu1 %v2825_v0  ;;  %v13_v1 = vld [vmem:[%s3405_s1] sm:$0xff]  ;;  %v14_v2 = vld [vmem:[%s3405_s1 + $0x8] sm:$0xff]  ;;  %v15_v3 = vld [vmem:[%s3405_s1 + $0x10] sm:$0xff]  ;;  %1802 = vmatprep.mubr.msk.f32.mxu1 %vm2826_vm0, %v2827_v4 }
   0x2   :  { %v2855_v5 = vpack.c.bf16 %v14_v2, %v13_v1  ;;  %v16_v6 = vld [vmem:[%s3405_s1 + $0x18] sm:$0xff]  ;;  %2422 = vmatprep.subr.bf16.mxu0 %v2825_v0  ;;  %1872 = vmatprep.mubr.msk.f32.mxu0 %vm2826_vm0, %v2827_v4  ;;  %v17_v8 = vld [vmem:[%s3405_s1 + $0x20] sm:$0xff]  ;;  %v18_v9 = vld [vmem:[%s3405_s1 + $0x28] sm:$0xff] }
   0x3   :  { %v2864_v7 = vpack.c.bf16 %v16_v6, %v15_v3  ;;  %v2876_v10 = vpack.c.bf16 %v18_v9, %v17_v8  ;;  %v19_v11 = vld [vmem:[%s3405_s1 + $0x30] sm:$0xff]  ;;  %v20_v12 = vld [vmem:[%s3405_s1 + $0x38] sm:$0xff]  ;;  %v21_v14 = vld [vmem:[%s3405_s1 + $0x40] sm:$0xff] }
   0x4   :  { %2376 = vmatpush3.bf16.msra.mxu1 %v2855_v5  ;;  %2424 = vmatpush3.bf16.msra.mxu0 %v2855_v5  ;;  %v2888_v13 = vpack.c.bf16 %v20_v12, %v19_v11  ;;  %v22_v15 = vld [vmem:[%s3405_s1 + $0x48] sm:$0xff]  ;;  %v23_v17 = vld [vmem:[%s3405_s1 + $0x50] sm:$0xff]  ;;  %v24_v18 = vld [vmem:[%s3405_s1 + $0x58] sm:$0xff] }
   0x5   :  { %2377 = vmatprep.subr.bf16.mxu1 %v2825_v0  ;;  %2425 = vmatprep.subr.bf16.mxu0 %v2825_v0  ;;  %v2900_v16 = vpack.c.bf16 %v22_v15, %v21_v14  ;;  %v2912_v19 = vpack.c.bf16 %v24_v18, %v23_v17  ;;  %v25_v20 = vld [vmem:[%s3405_s1 + $0x60] sm:$0xff]  ;;  %v26_v21 = vld [vmem:[%s3405_s1 + $0x68] sm:$0xff]  ;;  %v27_v23 = vld [vmem:[%s3405_s1 + $0x70] sm:$0xff] }
   0x6   :  { %v2924_v22 = vpack.c.bf16 %v26_v21, %v25_v20  ;;  %v28_v24 = vld [vmem:[%s3405_s1 + $0x78] sm:$0xff]  ;;  %v11_v26 = vld [vmem:[%s3406_s0] sm:$0xff]  ;;  %v12_v27 = vld [vmem:[%s3406_s0 + $0x8] sm:$0xff] }
   0x7   :  { %v2936_v25 = vpack.c.bf16 %v28_v24, %v27_v23  ;;  %v101_v32 = vld [vmem:[%s3406_s0 + $0x10] sm:$0xff]  ;;  %v174_v37 = vld [vmem:[%s3406_s0 + $0x18] sm:$0xff]  ;;  %v247_v42 = vld [vmem:[%s3406_s0 + $0x20] sm:$0xff] }
   0x8   :  { %2379 = vmatpush3.bf16.msra.mxu1 %v2864_v7  ;;  %2427 = vmatpush3.bf16.msra.mxu0 %v2864_v7  ;;  %v320_v47 = vld [vmem:[%s3406_s0 + $0x28] sm:$0xff]  ;;  %v393_v52 = vld [vmem:[%s3406_s0 + $0x30] sm:$0xff]  ;;  %v613_v57 = vld [vmem:[%s3405_s1 + $0x80] sm:$0xff] }
   0x9   :  { %2380 = vmatprep.subr.bf16.mxu1 %v2825_v0  ;;  %2428 = vmatprep.subr.bf16.mxu0 %v2825_v0  ;;  %v614_v58 = vld [vmem:[%s3405_s1 + $0x88] sm:$0xff]  ;;  %v615_v59 = vld [vmem:[%s3405_s1 + $0x90] sm:$0xff]  ;;  %v616_v61 = vld [vmem:[%s3405_s1 + $0x98] sm:$0xff] }
   0xa   :  { %v3085_v60 = vpack.c.bf16 %v614_v58, %v613_v57  ;;  %v3091_v62 = vpack.c.bf16 %v616_v61, %v615_v59  ;;  %v617_v63 = vld [vmem:[%s3405_s1 + $0xa0] sm:$0xff]  ;;  %v618_v1 = vld [vmem:[%s3405_s1 + $0xa8] sm:$0xff]  ;;  %v619_v3 = vld [vmem:[%s3405_s1 + $0xb0] sm:$0xff] }
   0xb   :  { %v3101_v2 = vpack.c.bf16 %v618_v1, %v617_v63  ;;  %v622_v8 = vld [vmem:[%s3405_s1 + $0xc8] sm:$0xff]  ;;  %v623_v15 = vld [vmem:[%s3405_s1 + $0xd0] sm:$0xff]  ;;  %v625_v18 = vld [vmem:[%s3405_s1 + $0xe0] sm:$0xff] }
   0xc   :  { %2382 = vmatpush3.bf16.msra.mxu1 %v2876_v10  ;;  %2430 = vmatpush3.bf16.msra.mxu0 %v2876_v10  ;;  %v627_v21 = vld [vmem:[%s3405_s1 + $0xf0] sm:$0xff]  ;;  %v539_v24 = vld [vmem:[%s3406_s0 + $0x40] sm:$0xff]  ;;  %v1345_v1 = vld [vmem:[%s3405_s1 + $0x128] sm:$0xff] }
   0xd   :  { %2383 = vmatprep.subr.bf16.mxu1 %v2825_v0  ;;  %2431 = vmatprep.subr.bf16.mxu0 %v2825_v0  ;;  %v1344_v63 = vld [vmem:[%s3405_s1 + $0x120] sm:$0xff] }
  0x10   :  { %2385 = vmatpush3.bf16.msra.mxu1 %v2888_v13  ;;  %2433 = vmatpush3.bf16.msra.mxu0 %v2888_v13 }
  0x11   :  { %2386 = vmatprep.subr.bf16.mxu1 %v2825_v0  ;;  %2434 = vmatprep.subr.bf16.mxu0 %v2825_v0 }
  0x14   :  { %2388 = vmatpush3.bf16.msra.mxu1 %v2900_v16  ;;  %2436 = vmatpush3.bf16.msra.mxu0 %v2900_v16 }
  0x15   :  { %2389 = vmatprep.subr.bf16.mxu1 %v2825_v0  ;;  %2437 = vmatprep.subr.bf16.mxu0 %v2825_v0 }
  0x18   :  { %2391 = vmatpush3.bf16.msra.mxu1 %v2912_v19  ;;  %2439 = vmatpush3.bf16.msra.mxu0 %v2912_v19 }
  0x19   :  { %2392 = vmatprep.subr.bf16.mxu1 %v2825_v0  ;;  %2440 = vmatprep.subr.bf16.mxu0 %v2825_v0 }
  0x1c   :  { %2394 = vmatpush3.bf16.msra.mxu1 %v2924_v22  ;;  %2442 = vmatpush3.bf16.msra.mxu0 %v2924_v22 }
  0x1d   :  { %2395 = vmatprep.subr.bf16.mxu1 %v2825_v0  ;;  %2443 = vmatprep.subr.bf16.mxu0 %v2825_v0 }
  0x20   :  { %2397 = vmatpush3.bf16.msra.mxu1 %v2936_v25  ;;  %2445 = vmatpush3.bf16.msra.mxu0 %v2936_v25 }
  0x21   :  { %2398 = vmatprep.subr.bf16.mxu1 %v2825_v0  ;;  %2470 = vmatprep.subr.bf16.mxu0 %v2825_v0 }
  0x23   :  { %1803 = vmatmul.mubr.f32.vlgmr.msra.gmra.mrb[0].mxu1 %v11_v26 }
  0x24   :  { %2400 = vmatpush3.bf16.msra.mxu1 %v2855_v5  ;;  %1837 = vmatprep.mubr.msk.f32.mxu1 %vm2826_vm0, %v2827_v4 }
  0x25   :  { %2401 = vmatprep.subr.bf16.mxu1 %v2825_v0 }
  0x28   :  { %2403 = vmatpush3.bf16.msra.mxu1 %v2864_v7 }
  0x29   :  { %2404 = vmatprep.subr.bf16.mxu1 %v2825_v0 }
  0x2c   :  { %2406 = vmatpush3.bf16.msra.mxu1 %v2876_v10 }
  0x2d   :  { %2407 = vmatprep.subr.bf16.mxu1 %v2825_v0 }
  0x30   :  { %2409 = vmatpush3.bf16.msra.mxu1 %v2888_v13 }
  0x31   :  { %2410 = vmatprep.subr.bf16.mxu1 %v2825_v0 }
  0x34   :  { %2412 = vmatpush3.bf16.msra.mxu1 %v2900_v16 }
  0x35   :  { %2413 = vmatprep.subr.bf16.mxu1 %v2825_v0 }
  0x38   :  { %2415 = vmatpush3.bf16.msra.mxu1 %v2912_v19 }
  0x39   :  { %2416 = vmatprep.subr.bf16.mxu1 %v2825_v0 }
  0x3c   :  { %2418 = vmatpush3.bf16.msra.mxu1 %v2924_v22 }
  0x3d   :  { %2419 = vmatprep.subr.bf16.mxu1 %v2825_v0 }
  0x40   :  { %2421 = vmatpush3.bf16.msra.mxu1 %v2936_v25 }
  0x41   :  { %2446 = vmatprep.subr.bf16.mxu1 %v2825_v0 }
  0xf6   :  { %v95_v28 = vpop.f32.mrb[0].mxu1 }
  0xf7   :  { %v99_v29 = vadd.f32 %v95_v28, %v12_v27  ;;  %v1804_v30 = vpop.f32.mrb[1].mxu1 }
  0xf9   :  { %2793 = vtanh.f32 %v99_v29  ;;  %v612_v29 = vld [vmem:[%s3406_s0 + $0x48] sm:$0xff] }
 0x103   :  { %v2794_v31 = vpop.eup %2793 }
 0x104   :  { %1838 = vmatmul.mubr.f32.vlgmr.msra.gmra.mrb[2].mxu1 %v2794_v31 }
 0x105   :  { %2448 = vmatpush3.bf16.msra.mxu1 %v2855_v5  ;;  %1907 = vmatprep.mubr.msk.f32.mxu1 %vm2826_vm0, %v2827_v4 }
 0x106   :  { %2449 = vmatprep.subr.bf16.mxu1 %v2825_v0 }
 0x109   :  { %2451 = vmatpush3.bf16.msra.mxu1 %v2864_v7 }
 0x10a   :  { %2452 = vmatprep.subr.bf16.mxu1 %v2825_v0 }
 0x10d   :  { %2454 = vmatpush3.bf16.msra.mxu1 %v2876_v10 }
 0x10e   :  { %2455 = vmatprep.subr.bf16.mxu1 %v2825_v0 }
 0x111   :  { %2457 = vmatpush3.bf16.msra.mxu1 %v2888_v13 }
 0x112   :  { %2458 = vmatprep.subr.bf16.mxu1 %v2825_v0 }
 0x115   :  { %2460 = vmatpush3.bf16.msra.mxu1 %v2900_v16 }
 0x116   :  { %2461 = vmatprep.subr.bf16.mxu1 %v2825_v0 }
 0x119   :  { %2463 = vmatpush3.bf16.msra.mxu1 %v2912_v19 }
 0x11a   :  { %2464 = vmatprep.subr.bf16.mxu1 %v2825_v0 }
 0x11d   :  { %2466 = vmatpush3.bf16.msra.mxu1 %v2924_v22 }
 0x11e   :  { %2467 = vmatprep.subr.bf16.mxu1 %v2825_v0 }
 0x121   :  { %2469 = vmatpush3.bf16.msra.mxu1 %v2936_v25 }
 0x122   :  { %2494 = vmatprep.subr.bf16.mxu1 %v2825_v0 }
 0x1d7   :  { %v168_v33 = vpop.f32.mrb[2].mxu1 }
 0x1d8   :  { %v172_v34 = vadd.f32 %v168_v33, %v101_v32  ;;  %v1839_v35 = vpop.f32.mrb[3].mxu1 }
 0x1da   :  { %2795 = vtanh.f32 %v172_v34  ;;  %v702_v34 = vld [vmem:[%s3406_s0 + $0x50] sm:$0xff] }
 0x1e4   :  { %v2796_v36 = vpop.eup %2795 }
 0x1e5   :  { %1873 = vmatmul.mubr.f32.vlgmr.msra.gmra.mrb[0].mxu0 %v2796_v36 }
 0x1e6   :  { %2472 = vmatpush3.bf16.msra.mxu0 %v2855_v5  ;;  %1942 = vmatprep.mubr.msk.f32.mxu0 %vm2826_vm0, %v2827_v4 }
 0x1e7   :  { %2473 = vmatprep.subr.bf16.mxu0 %v2825_v0 }
 0x1ea   :  { %2475 = vmatpush3.bf16.msra.mxu0 %v2864_v7 }
 0x1eb   :  { %2476 = vmatprep.subr.bf16.mxu0 %v2825_v0 }
 0x1ee   :  { %2478 = vmatpush3.bf16.msra.mxu0 %v2876_v10 }
 0x1ef   :  { %2479 = vmatprep.subr.bf16.mxu0 %v2825_v0 }
 0x1f2   :  { %2481 = vmatpush3.bf16.msra.mxu0 %v2888_v13 }
 0x1f3   :  { %2482 = vmatprep.subr.bf16.mxu0 %v2825_v0 }
 0x1f6   :  { %2484 = vmatpush3.bf16.msra.mxu0 %v2900_v16 }
 0x1f7   :  { %2485 = vmatprep.subr.bf16.mxu0 %v2825_v0 }
 0x1fa   :  { %2487 = vmatpush3.bf16.msra.mxu0 %v2912_v19 }
 0x1fb   :  { %2488 = vmatprep.subr.bf16.mxu0 %v2825_v0 }
 0x1fe   :  { %2490 = vmatpush3.bf16.msra.mxu0 %v2924_v22 }
 0x1ff   :  { %2491 = vmatprep.subr.bf16.mxu0 %v2825_v0 }
 0x202   :  { %2493 = vmatpush3.bf16.msra.mxu0 %v2936_v25 }
 0x203   :  { %2518 = vmatprep.subr.bf16.mxu0 %v2825_v0 }
 0x2b8   :  { %v241_v38 = vpop.f32.mrb[0].mxu0 }
 0x2b9   :  { %v245_v39 = vadd.f32 %v241_v38, %v174_v37  ;;  %v1874_v40 = vpop.f32.mrb[1].mxu0 }
 0x2bb   :  { %2797 = vtanh.f32 %v245_v39  ;;  %v792_v39 = vld [vmem:[%s3406_s0 + $0x58] sm:$0xff] }
 0x2c5   :  { %v2798_v41 = vpop.eup %2797 }
 0x2c6   :  { %1908 = vmatmul.mubr.f32.vlgmr.msra.gmra.mrb[4].mxu1 %v2798_v41 }
 0x2c7   :  { %2496 = vmatpush3.bf16.msra.mxu1 %v2855_v5  ;;  %1977 = vmatprep.mubr.msk.f32.mxu1 %vm2826_vm0, %v2827_v4 }
 0x2c8   :  { %2497 = vmatprep.subr.bf16.mxu1 %v2825_v0 }
 0x2cb   :  { %2499 = vmatpush3.bf16.msra.mxu1 %v2864_v7 }
 0x2cc   :  { %2500 = vmatprep.subr.bf16.mxu1 %v2825_v0 }
 0x2cf   :  { %2502 = vmatpush3.bf16.msra.mxu1 %v2876_v10 }
 0x2d0   :  { %2503 = vmatprep.subr.bf16.mxu1 %v2825_v0 }
 0x2d3   :  { %2505 = vmatpush3.bf16.msra.mxu1 %v2888_v13 }
 0x2d4   :  { %2506 = vmatprep.subr.bf16.mxu1 %v2825_v0 }
 0x2d7   :  { %2508 = vmatpush3.bf16.msra.mxu1 %v2900_v16 }
 0x2d8   :  { %2509 = vmatprep.subr.bf16.mxu1 %v2825_v0 }
 0x2db   :  { %2511 = vmatpush3.bf16.msra.mxu1 %v2912_v19 }
 0x2dc   :  { %2512 = vmatprep.subr.bf16.mxu1 %v2825_v0 }
 0x2df   :  { %2514 = vmatpush3.bf16.msra.mxu1 %v2924_v22 }
 0x2e0   :  { %2515 = vmatprep.subr.bf16.mxu1 %v2825_v0 }
 0x2e3   :  { %2517 = vmatpush3.bf16.msra.mxu1 %v2936_v25 }
 0x2e4   :  { %2542 = vmatprep.subr.bf16.mxu1 %v2825_v0 }
 0x399   :  { %v314_v43 = vpop.f32.mrb[4].mxu1 }
 0x39a   :  { %v318_v44 = vadd.f32 %v314_v43, %v247_v42  ;;  %v1909_v45 = vpop.f32.mrb[5].mxu1 }
 0x39c   :  { %2799 = vtanh.f32 %v318_v44  ;;  %v882_v44 = vld [vmem:[%s3406_s0 + $0x60] sm:$0xff] }
 0x3a6   :  { %v2800_v46 = vpop.eup %2799 }
 0x3a7   :  { %1943 = vmatmul.mubr.f32.vlgmr.msra.gmra.mrb[2].mxu0 %v2800_v46 }
 0x3a8   :  { %2520 = vmatpush3.bf16.msra.mxu0 %v2855_v5  ;;  %2012 = vmatprep.mubr.msk.f32.mxu0 %vm2826_vm0, %v2827_v4 }
 0x3a9   :  { %2521 = vmatprep.subr.bf16.mxu0 %v2825_v0 }
 0x3ac   :  { %2523 = vmatpush3.bf16.msra.mxu0 %v2864_v7 }
 0x3ad   :  { %2524 = vmatprep.subr.bf16.mxu0 %v2825_v0 }
 0x3b0   :  { %2526 = vmatpush3.bf16.msra.mxu0 %v2876_v10 }
 0x3b1   :  { %2527 = vmatprep.subr.bf16.mxu0 %v2825_v0 }
 0x3b4   :  { %2529 = vmatpush3.bf16.msra.mxu0 %v2888_v13 }
 0x3b5   :  { %2530 = vmatprep.subr.bf16.mxu0 %v2825_v0 }
 0x3b8   :  { %2532 = vmatpush3.bf16.msra.mxu0 %v2900_v16 }
 0x3b9   :  { %2533 = vmatprep.subr.bf16.mxu0 %v2825_v0 }
 0x3bc   :  { %2535 = vmatpush3.bf16.msra.mxu0 %v2912_v19 }
 0x3bd   :  { %2536 = vmatprep.subr.bf16.mxu0 %v2825_v0 }
 0x3c0   :  { %2538 = vmatpush3.bf16.msra.mxu0 %v2924_v22 }
 0x3c1   :  { %2539 = vmatprep.subr.bf16.mxu0 %v2825_v0 }
 0x3c4   :  { %2541 = vmatpush3.bf16.msra.mxu0 %v2936_v25 }
 0x3c5   :  { %2566 = vmatprep.subr.bf16.mxu0 %v2825_v0 }
 0x47a   :  { %v387_v48 = vpop.f32.mrb[2].mxu0 }
 0x47b   :  { %v391_v49 = vadd.f32 %v387_v48, %v320_v47  ;;  %v1944_v50 = vpop.f32.mrb[3].mxu0 }
 0x47d   :  { %2801 = vtanh.f32 %v391_v49  ;;  %v972_v49 = vld [vmem:[%s3406_s0 + $0x68] sm:$0xff] }
 0x487   :  { %v2802_v51 = vpop.eup %2801 }
 0x488   :  { %1978 = vmatmul.mubr.f32.vlgmr.msra.gmra.mrb[6].mxu1 %v2802_v51 }
 0x489   :  { %2544 = vmatpush3.bf16.msra.mxu1 %v2855_v5  ;;  %2047 = vmatprep.mubr.msk.f32.mxu1 %vm2826_vm0, %v2827_v4  ;;  %v620_v5 = vld [vmem:[%s3405_s1 + $0xb8] sm:$0xff] }
 0x48a   :  { %2545 = vmatprep.subr.bf16.mxu1 %v2825_v0  ;;  %v3111_v6 = vpack.c.bf16 %v620_v5, %v619_v3  ;;  %v1346_v3 = vld [vmem:[%s3405_s1 + $0x130] sm:$0xff]  ;;  %v1347_v5 = vld [vmem:[%s3405_s1 + $0x138] sm:$0xff] }
 0x48d   :  { %2547 = vmatpush3.bf16.msra.mxu1 %v2864_v7  ;;  %v621_v7 = vld [vmem:[%s3405_s1 + $0xc0] sm:$0xff] }
 0x48e   :  { %2548 = vmatprep.subr.bf16.mxu1 %v2825_v0  ;;  %v3121_v9 = vpack.c.bf16 %v622_v8, %v621_v7  ;;  %v1348_v7 = vld [vmem:[%s3405_s1 + $0x140] sm:$0xff]  ;;  %v1349_v8 = vld [vmem:[%s3405_s1 + $0x148] sm:$0xff] }
 0x491   :  { %2550 = vmatpush3.bf16.msra.mxu1 %v2876_v10  ;;  %v466_v10 = vld [vmem:[%s3406_s0 + $0x38] sm:$0xff] }
 0x492   :  { %2551 = vmatprep.subr.bf16.mxu1 %v2825_v0 }
 0x495   :  { %2553 = vmatpush3.bf16.msra.mxu1 %v2888_v13 }
 0x496   :  { %2554 = vmatprep.subr.bf16.mxu1 %v2825_v0 }
 0x499   :  { %2556 = vmatpush3.bf16.msra.mxu1 %v2900_v16  ;;  %v624_v16 = vld [vmem:[%s3405_s1 + $0xd8] sm:$0xff] }
 0x49a   :  { %2557 = vmatprep.subr.bf16.mxu1 %v2825_v0  ;;  %v3147_v17 = vpack.c.bf16 %v624_v16, %v623_v15  ;;  %v1354_v16 = vld [vmem:[%s3405_s1 + $0x170] sm:$0xff] }
 0x49d   :  { %2559 = vmatpush3.bf16.msra.mxu1 %v2912_v19  ;;  %v626_v19 = vld [vmem:[%s3405_s1 + $0xe8] sm:$0xff] }
 0x49e   :  { %2560 = vmatprep.subr.bf16.mxu1 %v2825_v0  ;;  %v3158_v20 = vpack.c.bf16 %v626_v19, %v625_v18  ;;  %v1152_v19 = vld [vmem:[%s3406_s0 + $0x78] sm:$0xff] }
 0x4a1   :  { %2562 = vmatpush3.bf16.msra.mxu1 %v2924_v22  ;;  %v628_v22 = vld [vmem:[%s3405_s1 + $0xf8] sm:$0xff] }
 0x4a2   :  { %2563 = vmatprep.subr.bf16.mxu1 %v2825_v0  ;;  %v3168_v23 = vpack.c.bf16 %v628_v22, %v627_v21 }
 0x4a5   :  { %2565 = vmatpush3.bf16.msra.mxu1 %v2936_v25 }
 0x4a6   :  { %2590 = vmatprep.subr.bf16.mxu1 %v2825_v0 }
 0x55b   :  { %v460_v53 = vpop.f32.mrb[6].mxu1 }
 0x55c   :  { %v464_v54 = vadd.f32 %v460_v53, %v393_v52  ;;  %v1979_v55 = vpop.f32.mrb[7].mxu1 }
 0x55e   :  { %2803 = vtanh.f32 %v464_v54  ;;  %v1341_v54 = vld [vmem:[%s3405_s1 + $0x108] sm:$0xff] }
 0x568   :  { %v2804_v56 = vpop.eup %2803 }
 0x569   :  { %2013 = vmatmul.mubr.f32.vlgmr.msra.gmra.mrb[4].mxu0 %v2804_v56  ;;  %v1062_v56 = vld [vmem:[%s3406_s0 + $0x70] sm:$0xff] }
 0x56a   :  { %2082 = vmatprep.mubr.msk.f32.mxu0 %vm2826_vm0, %v2827_v4  ;;  %2568 = vmatpush3.bf16.msra.mxu0 %v3085_v60 }
 0x56b   :  { %2569 = vmatprep.subr.bf16.mxu0 %v2825_v0 }
 0x56e   :  { %2571 = vmatpush3.bf16.msra.mxu0 %v3091_v62 }
 0x56f   :  { %2572 = vmatprep.subr.bf16.mxu0 %v2825_v0 }
 0x572   :  { %2574 = vmatpush3.bf16.msra.mxu0 %v3101_v2 }
 0x573   :  { %2575 = vmatprep.subr.bf16.mxu0 %v2825_v0 }
 0x576   :  { %2577 = vmatpush3.bf16.msra.mxu0 %v3111_v6 }
 0x577   :  { %2578 = vmatprep.subr.bf16.mxu0 %v2825_v0 }
 0x57a   :  { %2580 = vmatpush3.bf16.msra.mxu0 %v3121_v9 }
 0x57b   :  { %2581 = vmatprep.subr.bf16.mxu0 %v2825_v0 }
 0x57e   :  { %2583 = vmatpush3.bf16.msra.mxu0 %v3147_v17 }
 0x57f   :  { %2584 = vmatprep.subr.bf16.mxu0 %v2825_v0 }
 0x582   :  { %2586 = vmatpush3.bf16.msra.mxu0 %v3158_v20 }
 0x583   :  { %2587 = vmatprep.subr.bf16.mxu0 %v2825_v0 }
 0x586   :  { %2589 = vmatpush3.bf16.msra.mxu0 %v3168_v23 }
 0x587   :  { %2614 = vmatprep.subr.bf16.mxu0 %v2825_v0 }
 0x63c   :  { %v533_v11 = vpop.f32.mrb[4].mxu0 }
 0x63d   :  { %v537_v12 = vadd.f32 %v533_v11, %v466_v10  ;;  %v2014_v13 = vpop.f32.mrb[5].mxu0  ;;  %v1350_v10 = vld [vmem:[%s3405_s1 + $0x150] sm:$0xff]  ;;  %v1351_v11 = vld [vmem:[%s3405_s1 + $0x158] sm:$0xff] }
 0x63e   :  { %v1352_v13 = vld [vmem:[%s3405_s1 + $0x160] sm:$0xff] }
 0x63f   :  { %2805 = vtanh.f32 %v537_v12  ;;  %v2778_v12 = vpack.c.bf16 %v1351_v11, %v1350_v10 }
 0x649   :  { %v2806_v14 = vpop.eup %2805 }
 0x64a   :  { %2048 = vmatmul.mubr.f32.vlgmr.msra.gmra.mrb[8].mxu1 %v2806_v14  ;;  %v1353_v14 = vld [vmem:[%s3405_s1 + $0x168] sm:$0xff] }
 0x64b   :  { %2592 = vmatpush3.bf16.msra.mxu1 %v3085_v60  ;;  %2117 = vmatprep.mubr.msk.f32.mxu1 %vm2826_vm0, %v2827_v4  ;;  %v2782_v15 = vpack.c.bf16 %v1353_v14, %v1352_v13 }
 0x64c   :  { %2593 = vmatprep.subr.bf16.mxu1 %v2825_v0 }
 0x64f   :  { %2595 = vmatpush3.bf16.msra.mxu1 %v3091_v62 }
 0x650   :  { %2596 = vmatprep.subr.bf16.mxu1 %v2825_v0 }
 0x653   :  { %2598 = vmatpush3.bf16.msra.mxu1 %v3101_v2 }
 0x654   :  { %2599 = vmatprep.subr.bf16.mxu1 %v2825_v0 }
 0x657   :  { %2601 = vmatpush3.bf16.msra.mxu1 %v3111_v6 }
 0x658   :  { %2602 = vmatprep.subr.bf16.mxu1 %v2825_v0 }
 0x65b   :  { %2604 = vmatpush3.bf16.msra.mxu1 %v3121_v9 }
 0x65c   :  { %2605 = vmatprep.subr.bf16.mxu1 %v2825_v0 }
 0x65f   :  { %2607 = vmatpush3.bf16.msra.mxu1 %v3147_v17 }
 0x660   :  { %2608 = vmatprep.subr.bf16.mxu1 %v2825_v0 }
 0x663   :  { %2610 = vmatpush3.bf16.msra.mxu1 %v3158_v20 }
 0x664   :  { %2611 = vmatprep.subr.bf16.mxu1 %v2825_v0 }
 0x667   :  { %2613 = vmatpush3.bf16.msra.mxu1 %v3168_v23 }
 0x668   :  { %2638 = vmatprep.subr.bf16.mxu1 %v2825_v0 }
 0x71d   :  { %v606_v25 = vpop.f32.mrb[8].mxu1 }
 0x71e   :  { %v610_v26 = vadd.f32 %v606_v25, %v539_v24  ;;  %v2049_v27 = vpop.f32.mrb[9].mxu1  ;;  %v1356_v24 = vld [vmem:[%s3405_s1 + $0x180] sm:$0xff] }
 0x720   :  { %2807 = vtanh.f32 %v610_v26 }
 0x72a   :  { %v2808_v28 = vpop.eup %2807 }
 0x72b   :  { %2083 = vmatmul.mubr.f32.vlgmr.msra.gmra.mrb[6].mxu0 %v2808_v28 }
 0x72c   :  { %2616 = vmatpush3.bf16.msra.mxu0 %v3085_v60  ;;  %2152 = vmatprep.mubr.msk.f32.mxu0 %vm2826_vm0, %v2827_v4 }
 0x72d   :  { %2617 = vmatprep.subr.bf16.mxu0 %v2825_v0 }
 0x730   :  { %2619 = vmatpush3.bf16.msra.mxu0 %v3091_v62 }
 0x731   :  { %2620 = vmatprep.subr.bf16.mxu0 %v2825_v0 }
 0x734   :  { %2622 = vmatpush3.bf16.msra.mxu0 %v3101_v2 }
 0x735   :  { %2623 = vmatprep.subr.bf16.mxu0 %v2825_v0 }
 0x738   :  { %2625 = vmatpush3.bf16.msra.mxu0 %v3111_v6 }
 0x739   :  { %2626 = vmatprep.subr.bf16.mxu0 %v2825_v0 }
 0x73c   :  { %2628 = vmatpush3.bf16.msra.mxu0 %v3121_v9 }
 0x73d   :  { %2629 = vmatprep.subr.bf16.mxu0 %v2825_v0 }
 0x740   :  { %2631 = vmatpush3.bf16.msra.mxu0 %v3147_v17 }
 0x741   :  { %2632 = vmatprep.subr.bf16.mxu0 %v2825_v0 }
 0x744   :  { %2634 = vmatpush3.bf16.msra.mxu0 %v3158_v20 }
 0x745   :  { %2635 = vmatprep.subr.bf16.mxu0 %v2825_v0 }
 0x748   :  { %2637 = vmatpush3.bf16.msra.mxu0 %v3168_v23 }
 0x749   :  { %2662 = vmatprep.subr.bf16.mxu0 %v2825_v0 }
 0x7fe   :  { %v695_v30 = vpop.f32.mrb[6].mxu0 }
 0x7ff   :  { %v699_v31 = vadd.f32 %v695_v30, %v612_v29  ;;  %v2084_v32 = vpop.f32.mrb[7].mxu0 }
 0x801   :  { %2809 = vtanh.f32 %v699_v31 }
 0x80b   :  { %v3201_v33 = vpop.eup %2809 }
 0x80c   :  { %2118 = vmatmul.mubr.f32.vlgmr.msra.gmra.mrb[10].mxu1 %v3201_v33 }
 0x80d   :  { %2640 = vmatpush3.bf16.msra.mxu1 %v3085_v60  ;;  %2187 = vmatprep.mubr.msk.f32.mxu1 %vm2826_vm0, %v2827_v4 }
 0x80e   :  { %2641 = vmatprep.subr.bf16.mxu1 %v2825_v0 }
 0x811   :  { %2643 = vmatpush3.bf16.msra.mxu1 %v3091_v62 }
 0x812   :  { %2644 = vmatprep.subr.bf16.mxu1 %v2825_v0 }
 0x815   :  { %2646 = vmatpush3.bf16.msra.mxu1 %v3101_v2 }
 0x816   :  { %2647 = vmatprep.subr.bf16.mxu1 %v2825_v0 }
 0x819   :  { %2649 = vmatpush3.bf16.msra.mxu1 %v3111_v6 }
 0x81a   :  { %2650 = vmatprep.subr.bf16.mxu1 %v2825_v0 }
 0x81d   :  { %2652 = vmatpush3.bf16.msra.mxu1 %v3121_v9 }
 0x81e   :  { %2653 = vmatprep.subr.bf16.mxu1 %v2825_v0 }
 0x821   :  { %2655 = vmatpush3.bf16.msra.mxu1 %v3147_v17 }
 0x822   :  { %2656 = vmatprep.subr.bf16.mxu1 %v2825_v0 }
 0x825   :  { %2658 = vmatpush3.bf16.msra.mxu1 %v3158_v20 }
 0x826   :  { %2659 = vmatprep.subr.bf16.mxu1 %v2825_v0 }
 0x829   :  { %2661 = vmatpush3.bf16.msra.mxu1 %v3168_v23 }
 0x82a   :  { %2686 = vmatprep.subr.bf16.mxu1 %v2825_v0 }
 0x8df   :  { %v785_v35 = vpop.f32.mrb[10].mxu1 }
 0x8e0   :  { %v789_v36 = vadd.f32 %v785_v35, %v702_v34  ;;  %v2119_v37 = vpop.f32.mrb[11].mxu1 }
 0x8e1   :  { %v1242_v37 = vld [vmem:[%s3406_s0 + $0x80] sm:$0xff] }
 0x8e2   :  { %2811 = vtanh.f32 %v789_v36 }
 0x8ec   :  { %v3225_v38 = vpop.eup %2811 }
 0x8ed   :  { %2153 = vmatmul.mubr.f32.vlgmr.msra.gmra.mrb[8].mxu0 %v3225_v38 }
 0x8ee   :  { %2664 = vmatpush3.bf16.msra.mxu0 %v3085_v60  ;;  %2222 = vmatprep.mubr.msk.f32.mxu0 %vm2826_vm0, %v2827_v4 }
 0x8ef   :  { %2665 = vmatprep.subr.bf16.mxu0 %v2825_v0 }
 0x8f2   :  { %2667 = vmatpush3.bf16.msra.mxu0 %v3091_v62 }
 0x8f3   :  { %2668 = vmatprep.subr.bf16.mxu0 %v2825_v0 }
 0x8f6   :  { %2670 = vmatpush3.bf16.msra.mxu0 %v3101_v2 }
 0x8f7   :  { %2671 = vmatprep.subr.bf16.mxu0 %v2825_v0 }
 0x8fa   :  { %2673 = vmatpush3.bf16.msra.mxu0 %v3111_v6 }
 0x8fb   :  { %2674 = vmatprep.subr.bf16.mxu0 %v2825_v0 }
 0x8fe   :  { %2676 = vmatpush3.bf16.msra.mxu0 %v3121_v9 }
 0x8ff   :  { %2677 = vmatprep.subr.bf16.mxu0 %v2825_v0 }
 0x902   :  { %2679 = vmatpush3.bf16.msra.mxu0 %v3147_v17 }
 0x903   :  { %2680 = vmatprep.subr.bf16.mxu0 %v2825_v0 }
 0x906   :  { %2682 = vmatpush3.bf16.msra.mxu0 %v3158_v20 }
 0x907   :  { %2683 = vmatprep.subr.bf16.mxu0 %v2825_v0 }
 0x90a   :  { %2685 = vmatpush3.bf16.msra.mxu0 %v3168_v23 }
 0x90b   :  { %2710 = vmatprep.subr.bf16.mxu0 %v2825_v0 }
 0x9c0   :  { %v875_v40 = vpop.f32.mrb[8].mxu0 }
 0x9c1   :  { %v879_v41 = vadd.f32 %v875_v40, %v792_v39  ;;  %v2154_v42 = vpop.f32.mrb[9].mxu0 }
 0x9c3   :  { %2813 = vtanh.f32 %v879_v41 }
 0x9cd   :  { %v3249_v43 = vpop.eup %2813 }
 0x9ce   :  { %2188 = vmatmul.mubr.f32.vlgmr.msra.gmra.mrb[12].mxu1 %v3249_v43 }
 0x9cf   :  { %2688 = vmatpush3.bf16.msra.mxu1 %v3085_v60  ;;  %2257 = vmatprep.mubr.msk.f32.mxu1 %vm2826_vm0, %v2827_v4 }
 0x9d0   :  { %2689 = vmatprep.subr.bf16.mxu1 %v2825_v0 }
 0x9d3   :  { %2691 = vmatpush3.bf16.msra.mxu1 %v3091_v62 }
 0x9d4   :  { %2692 = vmatprep.subr.bf16.mxu1 %v2825_v0 }
 0x9d7   :  { %2694 = vmatpush3.bf16.msra.mxu1 %v3101_v2 }
 0x9d8   :  { %2695 = vmatprep.subr.bf16.mxu1 %v2825_v0 }
 0x9db   :  { %2697 = vmatpush3.bf16.msra.mxu1 %v3111_v6 }
 0x9dc   :  { %2698 = vmatprep.subr.bf16.mxu1 %v2825_v0 }
 0x9df   :  { %2700 = vmatpush3.bf16.msra.mxu1 %v3121_v9 }
 0x9e0   :  { %2701 = vmatprep.subr.bf16.mxu1 %v2825_v0 }
 0x9e3   :  { %2703 = vmatpush3.bf16.msra.mxu1 %v3147_v17 }
 0x9e4   :  { %2704 = vmatprep.subr.bf16.mxu1 %v2825_v0 }
 0x9e7   :  { %2706 = vmatpush3.bf16.msra.mxu1 %v3158_v20 }
 0x9e8   :  { %2707 = vmatprep.subr.bf16.mxu1 %v2825_v0 }
 0x9eb   :  { %2709 = vmatpush3.bf16.msra.mxu1 %v3168_v23 }
 0x9ec   :  { %2734 = vmatprep.subr.bf16.mxu1 %v2825_v0 }
 0xaa1   :  { %v965_v45 = vpop.f32.mrb[12].mxu1 }
 0xaa2   :  { %v969_v46 = vadd.f32 %v965_v45, %v882_v44  ;;  %v2189_v47 = vpop.f32.mrb[13].mxu1 }
 0xaa4   :  { %2815 = vtanh.f32 %v969_v46 }
 0xaae   :  { %v3273_v48 = vpop.eup %2815 }
 0xaaf   :  { %2223 = vmatmul.mubr.f32.vlgmr.msra.gmra.mrb[10].mxu0 %v3273_v48 }
 0xab0   :  { %2712 = vmatpush3.bf16.msra.mxu0 %v3085_v60  ;;  %2292 = vmatprep.mubr.msk.f32.mxu0 %vm2826_vm0, %v2827_v4 }
 0xab1   :  { %2713 = vmatprep.subr.bf16.mxu0 %v2825_v0 }
 0xab4   :  { %2715 = vmatpush3.bf16.msra.mxu0 %v3091_v62 }
 0xab5   :  { %2716 = vmatprep.subr.bf16.mxu0 %v2825_v0 }
 0xab8   :  { %2718 = vmatpush3.bf16.msra.mxu0 %v3101_v2 }
 0xab9   :  { %2719 = vmatprep.subr.bf16.mxu0 %v2825_v0 }
 0xabc   :  { %2721 = vmatpush3.bf16.msra.mxu0 %v3111_v6 }
 0xabd   :  { %2722 = vmatprep.subr.bf16.mxu0 %v2825_v0 }
 0xac0   :  { %2724 = vmatpush3.bf16.msra.mxu0 %v3121_v9 }
 0xac1   :  { %2725 = vmatprep.subr.bf16.mxu0 %v2825_v0 }
 0xac4   :  { %2727 = vmatpush3.bf16.msra.mxu0 %v3147_v17 }
 0xac5   :  { %2728 = vmatprep.subr.bf16.mxu0 %v2825_v0 }
 0xac8   :  { %2730 = vmatpush3.bf16.msra.mxu0 %v3158_v20 }
 0xac9   :  { %2731 = vmatprep.subr.bf16.mxu0 %v2825_v0 }
 0xacc   :  { %2733 = vmatpush3.bf16.msra.mxu0 %v3168_v23 }
 0xb82   :  { %v1055_v50 = vpop.f32.mrb[10].mxu0 }
 0xb83   :  { %v1059_v51 = vadd.f32 %v1055_v50, %v972_v49  ;;  %v2224_v52 = vpop.f32.mrb[11].mxu0 }
 0xb85   :  { %2817 = vtanh.f32 %v1059_v51 }
 0xb8f   :  { %v3296_v53 = vpop.eup %2817 }
 0xb90   :  { %2258 = vmatmul.mubr.f32.vlgmr.msra.gmra.mrb[14].mxu1 %v3296_v53 }
 0xb91   :  { %2736 = vmatpush3.bf16.msra.mxu1 %v3085_v60  ;;  %2327 = vmatprep.mubr.msk.f32.mxu1 %vm2826_vm0, %v2827_v4  ;;  %v1340_v4 = vld [vmem:[%s3405_s1 + $0x100] sm:$0xff]  ;;  %v1343_v60 = vld [vmem:[%s3405_s1 + $0x118] sm:$0xff] }
 0xb92   :  { %2737 = vmatprep.subr.bf16.mxu1 %v2825_v0  ;;  %v2758_v55 = vpack.c.bf16 %v1341_v54, %v1340_v4 }
 0xb94   :  { %2759 = vmatprep.subr.bf16.mxu0 %v2758_v55 }
 0xb95   :  { %2739 = vmatpush3.bf16.msra.mxu1 %v3091_v62 }
 0xb96   :  { %2740 = vmatprep.subr.bf16.mxu1 %v2825_v0 }
 0xb99   :  { %2742 = vmatpush3.bf16.msra.mxu1 %v3101_v2  ;;  %v2766_v2 = vpack.c.bf16 %v1345_v1, %v1344_v63 }
 0xb9a   :  { %2743 = vmatprep.subr.bf16.mxu1 %v2825_v0 }
 0xb9d   :  { %2745 = vmatpush3.bf16.msra.mxu1 %v3111_v6  ;;  %v2770_v6 = vpack.c.bf16 %v1347_v5, %v1346_v3 }
 0xb9e   :  { %2746 = vmatprep.subr.bf16.mxu1 %v2825_v0 }
 0xba1   :  { %2748 = vmatpush3.bf16.msra.mxu1 %v3121_v9  ;;  %v2774_v9 = vpack.c.bf16 %v1349_v8, %v1348_v7 }
 0xba2   :  { %2749 = vmatprep.subr.bf16.mxu1 %v2825_v0 }
 0xba5   :  { %2751 = vmatpush3.bf16.msra.mxu1 %v3147_v17  ;;  %v1355_v17 = vld [vmem:[%s3405_s1 + $0x178] sm:$0xff] }
 0xba6   :  { %2752 = vmatprep.subr.bf16.mxu1 %v2825_v0  ;;  %v2786_v18 = vpack.c.bf16 %v1355_v17, %v1354_v16 }
 0xba9   :  { %2754 = vmatpush3.bf16.msra.mxu1 %v3158_v20 }
 0xbaa   :  { %2755 = vmatprep.subr.bf16.mxu1 %v2825_v0  ;;  %v1342_v0 = vld [vmem:[%s3405_s1 + $0x110] sm:$0xff] }
 0xbab   :  { %v2762_v61 = vpack.c.bf16 %v1343_v60, %v1342_v0 }
 0xbad   :  { %2757 = vmatpush3.bf16.msra.mxu1 %v3168_v23 }
 0xc63   :  { %v1145_v57 = vpop.f32.mrb[14].mxu1 }
 0xc64   :  { %v1149_v58 = vadd.f32 %v1145_v57, %v1062_v56  ;;  %v2259_v59 = vpop.f32.mrb[15].mxu1 }
 0xc66   :  { %2819 = vtanh.f32 %v1149_v58 }
 0xc70   :  { %v2820_v62 = vpop.eup %2819 }
 0xc71   :  { %2293 = vmatmul.mubr.f32.vlgmr.msra.gmra.mrb[12].mxu0 %v2820_v62 }
 0xc72   :  { %2761 = vmatpush3.bf16.msra.mxu0 %v2758_v55  ;;  %2362 = vmatprep.mubr.f32.mxu0 %v3201_v33 }
 0xc73   :  { %2763 = vmatprep.subr.bf16.mxu0 %v2762_v61 }
 0xc76   :  { %2765 = vmatpush3.bf16.msra.mxu0 %v2762_v61 }
 0xc77   :  { %2767 = vmatprep.subr.bf16.mxu0 %v2766_v2 }
 0xc7a   :  { %2769 = vmatpush3.bf16.msra.mxu0 %v2766_v2 }
 0xc7b   :  { %2771 = vmatprep.subr.bf16.mxu0 %v2770_v6 }
 0xc7e   :  { %2773 = vmatpush3.bf16.msra.mxu0 %v2770_v6 }
 0xc7f   :  { %2775 = vmatprep.subr.bf16.mxu0 %v2774_v9 }
 0xc82   :  { %2777 = vmatpush3.bf16.msra.mxu0 %v2774_v9 }
 0xc83   :  { %2779 = vmatprep.subr.bf16.mxu0 %v2778_v12 }
 0xc86   :  { %2781 = vmatpush3.bf16.msra.mxu0 %v2778_v12 }
 0xc87   :  { %2783 = vmatprep.subr.bf16.mxu0 %v2782_v15 }
 0xc8a   :  { %2785 = vmatpush3.bf16.msra.mxu0 %v2782_v15 }
 0xc8b   :  { %2787 = vmatprep.subr.bf16.mxu0 %v2786_v18 }
 0xc8e   :  { %2789 = vmatpush3.bf16.msra.mxu0 %v2786_v18 }
 0xc91   :  { %2363 = vmatmul.mubr.f32.vlgmr.msra.gmra.mrb[14].mxu0 %v3225_v38 }
 0xc92   :  { %2365 = vmatprep.mubr.f32.mxu0 %v3249_v43 }
 0xc95   :  { %2366 = vmatmul.mubr.f32.gmra.mrb[16].mxu0 %v3273_v48 }
 0xc96   :  { %2368 = vmatprep.mubr.f32.mxu0 %v3296_v53 }
 0xc99   :  { %2369 = vmatmul.mubr.f32.gmra.mrb[18].mxu0 %v2820_v62 }
 0xd44   :  { %v1235_v20 = vpop.f32.mrb[12].mxu0 }
 0xd45   :  { %v1239_v21 = vadd.f32 %v1235_v20, %v1152_v19  ;;  %v2294_v22 = vpop.f32.mrb[13].mxu0 }
 0xd47   :  { %2821 = vtanh.f32 %v1239_v21 }
 0xd51   :  { %v2822_v23 = vpop.eup %2821 }
 0xd52   :  { %2328 = vmatmul.mubr.f32.vlgmr.msra.gmra.mrb[16].mxu1 %v2822_v23  ;;  %2371 = vmatprep.mubr.f32.mxu0 %v2822_v23 }
 0xd64   :  { %v2364_v25 = vpop.f32.mrb[14].mxu0 }
 0xd65   :  { %v1429_v26 = vadd.f32 %v2364_v25, %v1356_v24  ;;  %v1423_v27 = vpop.f32.mrb[15].mxu0 }
 0xd66   :  { %v1424_v28 = vadd.f32 %v1423_v27, %v1356_v24 }
 0xd67   :  { %1463 = vst [vmem:[%s3407_s2 + $0x8] sm:$0xff] %v1429_v26 }
 0xd68   :  { %1462 = vst [vmem:[%s3407_s2] sm:$0xff] %v1424_v28  ;;  %v2367_v29 = vpop.f32.mrb[16].mxu0 }
 0xd69   :  { %v1439_v30 = vadd.f32 %v2367_v29, %v1356_v24  ;;  %v1433_v31 = vpop.f32.mrb[17].mxu0 }
 0xd6a   :  { %v1434_v32 = vadd.f32 %v1433_v31, %v1356_v24 }
 0xd6b   :  { %1465 = vst [vmem:[%s3407_s2 + $0x18] sm:$0xff] %v1439_v30 }
 0xd6c   :  { %1464 = vst [vmem:[%s3407_s2 + $0x10] sm:$0xff] %v1434_v32  ;;  %v2370_v33 = vpop.f32.mrb[18].mxu0 }
 0xd6d   :  { %v1449_v34 = vadd.f32 %v2370_v33, %v1356_v24  ;;  %v1443_v35 = vpop.f32.mrb[19].mxu0 }
 0xd6e   :  { %v1444_v36 = vadd.f32 %v1443_v35, %v1356_v24 }
 0xd6f   :  { %1467 = vst [vmem:[%s3407_s2 + $0x28] sm:$0xff] %v1449_v34 }
 0xd70   :  { %1466 = vst [vmem:[%s3407_s2 + $0x20] sm:$0xff] %v1444_v36 }
 0xe25   :  { %v1325_v38 = vpop.f32.mrb[16].mxu1 }
 0xe26   :  { %v1329_v39 = vadd.f32 %v1325_v38, %v1242_v37  ;;  %v2329_v40 = vpop.f32.mrb[17].mxu1 }
 0xe28   :  { %2823 = vtanh.f32 %v1329_v39 }
 0xe32   :  { %v2824_v41 = vpop.eup %2823 }
 0xe33   :  { %2372 = vmatmul.mubr.f32.gmra.mrb[20].mxu0 %v2824_v41 }
 0xf06   :  { %v2373_v42 = vpop.f32.mrb[20].mxu0 }
 0xf07   :  { %v1459_v43 = vadd.f32 %v2373_v42, %v1356_v24  ;;  %v1453_v44 = vpop.f32.mrb[21].mxu0 }
 0xf08   :  { %v1454_v45 = vadd.f32 %v1453_v44, %v1356_v24 }
 0xf09   :  { %1469 = vst [vmem:[%s3407_s2 + $0x38] sm:$0xff] %v1459_v43 }
 0xf0a   :  { %1468 = vst [vmem:[%s3407_s2 + $0x30] sm:$0xff] %v1454_v45 }

</bundles_post_ra>
